<compile_context>
chip_gen: v7x
topology: tpu7x:2x2x1
jax: 0.10.0
libtpu: 0.0.40
codegen_flags: <defaults>
</compile_context>

<pallas_src>
import jax
import jax.numpy as jnp
from jax.experimental import pallas as pl
from jax.experimental.pallas import tpu as pltpu

_FAST_PATH_ELEMS = 64 * 1024          # below this a single fused XLA op wins
_TILE_ELEMS = 512 * 1024              # per-input tile: 2 MiB f32 / 1 MiB bf16
_LANE_CHOICES = (512, 256, 128)       # lane-dense widths (multiples of 128)
_NUM_SHARDS = 2                       # outer 'parallel' axis -> both v7x TCs
_VMEM_LIMIT_BYTES = 32 * 1024 * 1024  # raises v5e's 16 MiB default; <= v7x physical


def _round_up(x, m):
    return ((x + m - 1) // m) * m


def _make_triplet_kernel(rows, tm, tn, steps, needs_mask):
    """Hinge on a (tm, tn) tile, accumulate (8, tn) partial sums in out_ref."""

    def kernel(margin_ref, pos_ref, neg_ref, out_ref):
        s = pl.program_id(1)

        @pl.when(s == 0)
        def _init():
            out_ref[...] = jnp.zeros_like(out_ref)

        margin = margin_ref[0]                                # SMEM f32 scalar
        p = pos_ref[...].astype(jnp.float32)
        n = neg_ref[...].astype(jnp.float32)
        hinge = jnp.maximum(p - n + margin, 0.0)              # VPU elementwise

        if needs_mask:
            # Rows >= `rows` (partial last tile / clamped duplicate tile) hold
            # stale VMEM data -> select them to 0 (NaN-safe, margin-agnostic).
            blk = pl.program_id(0) * steps + s
            row_ids = blk * tm + jax.lax.broadcasted_iota(jnp.int32, (tm, tn), 0)
            hinge = jnp.where(row_ids < rows, hinge, 0.0)

        # Sublane-group partial sums: VPU adds only; the single cross-lane
        # reduce happens once on the tiny (shards, 8, tn) epilogue.
        out_ref[...] += hinge.reshape(tm // 8, 8, tn).sum(axis=0)[None]

    return kernel


def triplet_loss(pos_dist, neg_dist, margin=1.0):
    """Pallas TPU TripletLoss.forward: mean(clamp(pos - neg + margin, min=0))."""
    assert pos_dist.shape == neg_dist.shape, "pos/neg distance shapes must match"
    total = int(pos_dist.size)

    # Small inputs: one fused XLA elementwise+reduce beats pad/launch/epilogue.
    if total <= _FAST_PATH_ELEMS:
        return jnp.mean(jnp.maximum(pos_dist.astype(jnp.float32)
                                    - neg_dist.astype(jnp.float32)
                                    + jnp.float32(margin), 0.0))

    # Stream f32 / bf16 natively (no wrapper astype copy); exotic dtypes -> f32.
    work_dtype = jnp.dtype(pos_dist.dtype)
    if work_dtype not in (jnp.dtype(jnp.bfloat16), jnp.dtype(jnp.float32)):
        work_dtype = jnp.dtype(jnp.float32)
    pos_flat = pos_dist.reshape(-1)
    neg_flat = neg_dist.reshape(-1)
    if pos_flat.dtype != work_dtype:
        pos_flat = pos_flat.astype(work_dtype)
    if neg_flat.dtype != work_dtype:
        neg_flat = neg_flat.astype(work_dtype)

    # Lane width: largest 128-multiple dividing `total` -> reshape only (free).
    # Otherwise append a <128-element pad whose hinge is identically 0:
    # clamp(0 - inf + margin, 0) == 0 for any finite margin.
    tn = next((t for t in _LANE_CHOICES if total % t == 0), None)
    padded_total = total
    if tn is None:
        tn = 128
        padded_total = _round_up(total, tn)
        pad = padded_total - total
        pos_flat = jnp.pad(pos_flat, (0, pad), constant_values=0.0)
        neg_flat = jnp.pad(neg_flat, (0, pad), constant_values=jnp.inf)
    rows = padded_total // tn
    pos2d = pos_flat.reshape(rows, tn)
    neg2d = neg_flat.reshape(rows, tn)

    # Row tiling: at least _NUM_SHARDS row tiles so the 'parallel' axis spans
    # both v7x TensorCores; per-input tile capped at _TILE_ELEMS so buffers +
    # temporaries fit comfortably in scoped VMEM on v5e/v6e/v7x.
    max_tm = max(8, (_TILE_ELEMS // tn) // 8 * 8)
    nt = max(pl.cdiv(rows, max_tm), _NUM_SHARDS)
    tm = min(max_tm, _round_up(pl.cdiv(rows, nt), 8))
    nt = pl.cdiv(rows, tm)                     # row tiles actually needed
    steps = pl.cdiv(nt, _NUM_SHARDS)           # inner reduction steps per shard
    last_blk = nt - 1
    needs_mask = _NUM_SHARDS * steps * tm != rows

    def in_map(p, s, margin_ref):
        # Clamp so a trailing (fully row-masked) step never DMAs out of bounds.
        return (jnp.minimum(p * steps + s, last_blk), 0)

    margin_arr = jnp.full((1,), margin, jnp.float32)
    itemsize = jnp.dtype(work_dtype).itemsize

    partials = pl.pallas_call(
        _make_triplet_kernel(rows, tm, tn, steps, needs_mask),
        out_shape=jax.ShapeDtypeStruct((_NUM_SHARDS, 8, tn), jnp.float32),
        grid_spec=pltpu.PrefetchScalarGridSpec(
            num_scalar_prefetch=1,                       # margin -> SMEM
            grid=(_NUM_SHARDS, steps),
            in_specs=[pl.BlockSpec((tm, tn), in_map),
                      pl.BlockSpec((tm, tn), in_map)],
            out_specs=pl.BlockSpec((1, 8, tn), lambda p, s, m: (p, 0, 0)),
        ),
        compiler_params=pltpu.CompilerParams(
            dimension_semantics=("parallel", "arbitrary"),
            vmem_limit_bytes=_VMEM_LIMIT_BYTES),
        cost_estimate=pl.CostEstimate(
            flops=4 * total,
            transcendentals=0,
            bytes_accessed=2 * padded_total * itemsize + _NUM_SHARDS * 8 * tn * 4),
    )(margin_arr, pos2d, neg2d)

    # Tiny epilogue: reduce (shards, 8, tn) partials, divide by the TRUE count.
    return jnp.sum(partials) / jnp.float32(total)


if __name__ == "__main__":
    key = jax.random.PRNGKey(0)
    k1, k2, k3, k4, k5, k6 = jax.random.split(key, 6)
    margin = 1.0

    def ref_loss(p, n):
        return jnp.mean(jnp.maximum(p - n + margin, 0.0))

    # 1) tiny input (batch=4, 64 distance entries) -> fused jnp fast path
    pos_s = jax.random.uniform(k1, (4, 64), dtype=jnp.float32) * 2.0
    neg_s = jax.random.uniform(k2, (4, 64), dtype=jnp.float32) * 2.0
    out_s = jax.block_until_ready(triplet_loss(pos_s, neg_s, margin))
    assert jnp.allclose(out_s, ref_loss(pos_s, neg_s), rtol=1e-4, atol=1e-5), out_s

    # 2) lane-aligned input -> Pallas kernel (zero-copy reshape, row-tail mask)
    pos_a = jax.random.uniform(k3, (257, 512), dtype=jnp.float32) * 2.0
    neg_a = jax.random.uniform(k4, (257, 512), dtype=jnp.float32) * 2.0
    out_a = jax.block_until_ready(triplet_loss(pos_a, neg_a, margin))
    assert jnp.allclose(out_a, ref_loss(pos_a, neg_a), rtol=1e-4, atol=1e-5), out_a

    # 3) awkward size (not a multiple of 128) -> Pallas kernel, tail pad + mask
    pos_b = jax.random.uniform(k5, (250, 517), dtype=jnp.float32) * 2.0
    neg_b = jax.random.uniform(k6, (250, 517), dtype=jnp.float32) * 2.0
    out_b = jax.block_until_ready(triplet_loss(pos_b, neg_b, margin))
    assert jnp.allclose(out_b, ref_loss(pos_b, neg_b), rtol=1e-4, atol=1e-5), out_b

    print("KERNEL_OK")
</pallas_src>

<mosaic_0001>
module attributes {stable_mosaic.version = 11 : i64} {
  func.func @kernel(%arg0: i32, %arg1: i32, %arg2: memref<1xf32, #tpu.memory_space<smem>>, %arg3: memref<136x512xf32, #tpu.memory_space<vmem>>, %arg4: memref<136x512xf32, #tpu.memory_space<vmem>>, %arg5: memref<1x8x512xf32, #tpu.memory_space<vmem>>) attributes {dimension_semantics = [#tpu.dimension_semantics<parallel>, #tpu.dimension_semantics<arbitrary>], iteration_bounds = array<i64: 2, 1>, scalar_prefetch = 1 : i64, scratch_operands = 0 : i64, tpu.core_type = #tpu.core_type<tc>, window_params = [{transform_indices = @transform_0, window_bounds = array<i64: 136, 512>}, {transform_indices = @transform_1, window_bounds = array<i64: 136, 512>}, {transform_indices = @transform_2, window_bounds = array<i64: 1, 8, 512>}]} {
    %c0_i32 = arith.constant 0 : i32
    %0 = arith.cmpi eq, %arg1, %c0_i32 : i32
    %1 = arith.extui %0 : i1 to i32
    %c0_i32_0 = arith.constant 0 : i32
    %2 = arith.cmpi ne, %1, %c0_i32_0 : i32
    scf.if %2 {
      %cst_13 = arith.constant 0.000000e+00 : f32
      %27 = vector.broadcast %cst_13 : f32 to vector<1x8x512xf32>
      %c0_14 = arith.constant 0 : index
      %c0_15 = arith.constant 0 : index
      %c0_16 = arith.constant 0 : index
      %28 = vector.load %arg5[%c0_14, %c0_15, %c0_16] : memref<1x8x512xf32, #tpu.memory_space<vmem>>, vector<1x8x512xf32>
      tpu.vector_store %arg5[%c0_14, %c0_15, %c0_16], %27 {strides = array<i32>} : memref<1x8x512xf32, #tpu.memory_space<vmem>>, vector<1x8x512xf32>,
    } else {
    }
    %c0 = arith.constant 0 : index
    %3 = memref.load %arg2[%c0] : memref<1xf32, #tpu.memory_space<smem>>
    %c0_1 = arith.constant 0 : index
    %c0_2 = arith.constant 0 : index
    %4 = vector.load %arg3[%c0_1, %c0_2] : memref<136x512xf32, #tpu.memory_space<vmem>>, vector<136x512xf32>
    %c0_3 = arith.constant 0 : index
    %c0_4 = arith.constant 0 : index
    %5 = vector.load %arg4[%c0_3, %c0_4] : memref<136x512xf32, #tpu.memory_space<vmem>>, vector<136x512xf32>
    %6 = arith.subf %4, %5 : vector<136x512xf32>
    %7 = vector.broadcast %3 : f32 to vector<136x512xf32>
    %8 = arith.addf %6, %7 : vector<136x512xf32>
    %cst = arith.constant 0.000000e+00 : f32
    %9 = vector.broadcast %cst : f32 to vector<136x512xf32>
    %10 = arith.maximumf %8, %9 : vector<136x512xf32>
    %c1_i32 = arith.constant 1 : i32
    %11 = arith.muli %arg0, %c1_i32 : i32
    %12 = arith.addi %11, %arg1 : i32
    %c136_i32 = arith.constant 136 : i32
    %13 = arith.muli %12, %c136_i32 : i32
    %14 = tpu.iota {dimensions = array<i32: 0>} : vector<136x512xi32>
    %15 = vector.broadcast %13 : i32 to vector<136x512xi32>
    %16 = arith.addi %15, %14 : vector<136x512xi32>
    %c257_i32 = arith.constant 257 : i32
    %17 = vector.broadcast %c257_i32 : i32 to vector<136x512xi32>
    %18 = arith.cmpi slt, %16, %17 : vector<136x512xi32>
    %cst_5 = arith.constant 0.000000e+00 : f32
    %19 = vector.broadcast %cst_5 : f32 to vector<136x512xf32>
    %20 = arith.select %18, %10, %19 : vector<136x512xi1>, vector<136x512xf32>
    %c0_6 = arith.constant 0 : index
    %c0_7 = arith.constant 0 : index
    %c0_8 = arith.constant 0 : index
    %21 = vector.load %arg5[%c0_6, %c0_7, %c0_8] : memref<1x8x512xf32, #tpu.memory_space<vmem>>, vector<1x8x512xf32>
    %22 = vector.shape_cast %20 : vector<136x512xf32> to vector<17x8x512xf32>
    %cst_9 = arith.constant dense<0.000000e+00> : vector<8x512xf32>
    %23 = vector.multi_reduction <add>, %22, %cst_9 [0] : vector<17x8x512xf32> to vector<8x512xf32>
    %24 = vector.shape_cast %23 : vector<8x512xf32> to vector<1x8x512xf32>
    %25 = arith.addf %21, %24 : vector<1x8x512xf32>
    %c0_10 = arith.constant 0 : index
    %c0_11 = arith.constant 0 : index
    %c0_12 = arith.constant 0 : index
    %26 = vector.load %arg5[%c0_10, %c0_11, %c0_12] : memref<1x8x512xf32, #tpu.memory_space<vmem>>, vector<1x8x512xf32>
    tpu.vector_store %arg5[%c0_10, %c0_11, %c0_12], %25 {strides = array<i32>} : memref<1x8x512xf32, #tpu.memory_space<vmem>>, vector<1x8x512xf32>,
    return
  }
  func.func @transform_0(%arg0: i32, %arg1: i32, %arg2: memref<1xf32, #tpu.memory_space<smem>>) -> (i32, i32) {
    %c1_i32 = arith.constant 1 : i32
    %0 = arith.muli %arg0, %c1_i32 : i32
    %1 = arith.addi %0, %arg1 : i32
    %c1_i32_0 = arith.constant 1 : i32
    %2 = arith.minsi %1, %c1_i32_0 : i32
    %c0_i32 = arith.constant 0 : i32
    %c0_i32_1 = arith.constant 0 : i32
    return %2, %c0_i32 : i32, i32
  }
  func.func @transform_1(%arg0: i32, %arg1: i32, %arg2: memref<1xf32, #tpu.memory_space<smem>>) -> (i32, i32) {
    %c1_i32 = arith.constant 1 : i32
    %0 = arith.muli %arg0, %c1_i32 : i32
    %1 = arith.addi %0, %arg1 : i32
    %c1_i32_0 = arith.constant 1 : i32
    %2 = arith.minsi %1, %c1_i32_0 : i32
    %c0_i32 = arith.constant 0 : i32
    %c0_i32_1 = arith.constant 0 : i32
    return %2, %c0_i32 : i32, i32
  }
  func.func @transform_2(%arg0: i32, %arg1: i32, %arg2: memref<1xf32, #tpu.memory_space<smem>>) -> (i32, i32, i32) {
    %c0_i32 = arith.constant 0 : i32
    %c0_i32_0 = arith.constant 0 : i32
    %c0_i32_1 = arith.constant 0 : i32
    return %arg0, %c0_i32, %c0_i32_0 : i32, i32, i32
  }
}

</mosaic_0001>

<bundles_post_ra>
// kernel: tpu_custom_call.1
= control target key start
LH: loop header
LB: loop body
LE: loop exit
PB: predicated region body
PF: predicated region fallthrough
CT: control target
= control target key end

     0   :  { %s1955_s0 = inlined_call_operand.<no memory space> [shape: f32[1], index: 0, kind: input, shape index: {}]   ;;  %s1956_s1 = inlined_call_operand.hbm [shape: f32[257,512], index: 1, kind: input, shape index: {}]   ;;  %s1957_s2 = inlined_call_operand.hbm [shape: f32[257,512], index: 2, kind: input, shape index: {}]   ;;  %s1958_s3 = inlined_call_operand.hbm [shape: f32[2,8,512], index: 3, kind: output, shape index: {}]  }
   0x1   :  { %8 = sst [smem:[#allocation3]] %s1955_s0 }
   0x2   :  { %9 = vsyncpa [#allocation5], 0 }
   0x3   :  { %11 = vsyncpa [#allocation5 + $0x1], 0 }
   0x4   :  { %12 = vsyncpa [#allocation8], 0 }
   0x5   :  { %14 = vsyncpa [#allocation8 + $0x1], 0 }
   0x6   :  { %15 = vsyncpa [#allocation6], 0 }
   0x7   :  { %17 = vsyncpa [#allocation6 + $0x1], 0  ;;  %s1254_s14 = smov 0   ;;  %s1256_s15 = smov 0  }
   0x8   :  { %s1258_s16 = smov 0   ;;  %s1260_s17 = smov 0  }
   0x9   :  { %s1262_s18 = smov 0   ;;  %s1264_s19 = smov 0  }
   0xa   :  { %s1266_s20 = smov 0   ;;  %s1268_s0 = smov 0  }
   0xb   :  { %s1270_s21 = smov 0  }
   0xc LB: > { %s933_s22 = sadd.s32 4294967295, %s1222_s21   ;;  %s934_s23 = sadd.s32 4294967294, %s1222_s21   ;;  %s1222_s21 = sphi %s1270_s21, %s23_s21   ;;  %s1218_s0 = sphi %s1268_s0, %s1987_s0   ;;  %s1214_s20 = sphi %s1266_s20, %s1986_s20   ;;  %s1210_s19 = sphi %s1264_s19, %s1985_s19   ;;  %s1206_s18 = sphi %s1262_s18, %s1984_s18   ;;  %s1202_s17 = sphi %s1260_s17, %s1983_s17   ;;  %s1198_s16 = sphi %s1258_s16, %s1982_s16   ;;  %s1194_s15 = sphi %s1256_s15, %s1981_s15   ;;  %s1190_s14 = sphi %s1254_s14, %s1980_s14  }
   0xd   : > { %s35_s24 = sadd.s32 1, %s1218_s0  ;;  %p40_p0 = scmp.lt.s32.totalorder %s1218_s0, 1 }
   0xe   : > { %p37_p1 = scmp.ge.s32.totalorder %s35_s24, 2  ;;  %s48_s25 = sadd.s32 1, %s1210_s19 }
   0xf   : > { %s1303_s26 = scalar_select %p40_p0, %s1218_s0, 1 }
  0x10   : > { %s1989_s24 = smov (%p37_p1, %s35_s24), 0  ;;  %p55_p2 = scmp.ne.s32.totalorder %s1210_s19, %s1206_s18 }
  0x11   : > { %1965 = sst [smem:[#allocation13_spill]] %s1989_s24  ;;  %p56_p3 = scmp.eq.s32.totalorder %s1222_s21, 0 }
  0x12   : > { %p43_p4 = scmp.lt.s32.totalorder %s1989_s24, 1  ;;  %p61_p5 = scmp.ne.s32.totalorder %s1206_s18, %s1202_s17 }
  0x13   : > { %p1312_p6 = por %p56_p3, %p55_p2  ;;  %p62_p7 = scmp.eq.s32.totalorder %s933_s22, 0 }
  0x14   : > { %s44_s28 = scalar_select %p43_p4, %s1989_s24, 1 }
  0x15   : > { %p1317_p8 = por %p62_p7, %p61_p5  ;;  %s103_s30 = ssub.s32 %s1218_s0, %s1989_s24 }
  0x16   : > { %s45_s4 = ssub.s32 %s1303_s26, %s44_s28  ;;  %p104_p9 = scmp.eq.s32.totalorder %s103_s30, 0 }
  0x17   : > { %p46_p10 = scmp.eq.s32.totalorder %s45_s4, 0  ;;  %s106_s5 = sadd.s32 1, %s1198_s16 }
  0x18   : > { %s1326_s6 = scalar_select %p104_p9, %s1198_s16, %s106_s5  }
  0x19   : > { %s1329_s7 = scalar_select %p46_p10, %s1210_s19, %s48_s25  }
  0x1a   : > { %p116_p11 = scmp.ne.s32.totalorder %s1198_s16, %s1194_s15  ;;  %p117_p12 = scmp.eq.s32.totalorder %s933_s22, 1 }
  0x1b   : > { %p122_p13 = scmp.ne.s32.totalorder %s1194_s15, %s1190_s14  ;;  %p123_p0 = scmp.eq.s32.totalorder %s934_s23, 1 }
  0x1c   : > { %p1335_p1 = por %p117_p12, %p116_p11  ;;  %p1960_p3 = scmp.ge.s32.totalorder %s1222_s21, 2 }
  0x1d   : > { %p1339_p2 = por %p123_p0, %p122_p13 }
  0x1e   : > { %s1968_s8 = scalar_select %p1335_p1, 1, 0 }
  0x1f   : > { %s1969_s9 = scalar_select %p1339_p2, 1, 0 }
  0x20   : > { %139 = sbr.rel (%p1960_p3) target bundleno = 109 (0x6d), region = 16 }
  0x27   : > { %142 = sbr.rel (!%p1312_p6) target bundleno = 74 (0x4a), region = 20  ;;  %s143_s10 = sand.u32 (%p1312_p6), 1, %s1210_s19  }
  0x28   : > { %s151_s11 = smul.u32 (%p1312_p6), 17, %s1303_s26  ;;  %s1353_s23 = scalar_lea.sflag (%p1312_p6), [#allocation5], %s143_s10 }
  0x29   : > { %s967_s12 = smul.u32 (%p1312_p6), 544, %s143_s10 }
  0x2a   : > { %s152_s13 = ssub.s32 (%p1312_p6), 33, %s151_s11 }
  0x2b   : > { %p153_p4 = scmp.lt.s32.totalorder (%p1312_p6), %s152_s13, 17  ;;  %s147_s25 = scalar_lea.vmem (%p1312_p6), [#allocation4], %s967_s12 }
  0x2e   : > { %s1991_s13 = smov (!%p153_p4, %s152_s13), 17 }
  0x2f   : > { %s1350_s17 = sshll.u32 %s1991_s13, 9 }
  0x30   : > { %s158_s22 = ssub.s32 8704, %s1350_s17 }
  0x31   : > { %159 = vsyncadd %s1353_s23, %s158_s22  ;;  %p939_p5 = scmp.ne.s32.totalorder %s1350_s17, 0  ;;  %s965_s28 = smul.u32 8704, %s1303_s26 }
  0x32   : > { %s165_s30 = sshll.u32 %s147_s25, 4  ;;  %s1060_s22 = scalar_lea.hbm %s1956_s1, 16896  ;;  %s1363_s30 = int_to_ptr.vmem [resolvable:$true] %s165_s30 }
  0x33   : > { %s1361_s11 = scalar_lea.hbm %s1956_s1, %s965_s28 }
  0x34   : > { %s1056_s10 = scalar_lea.hbm %s1361_s11, %s1350_s17  ;;  %p1061_p11 = scmp.lt.u32.totalorder %s1361_s11, %s1956_s1 }
  0x35   : > { %p1057_p7 = scmp.ne.s32.totalorder %s1361_s11, %s1056_s10  ;;  %p1062_p12 = scmp.lt.u32.totalorder %s1060_s22, %s1056_s10 }
  0x36   : > { %p1064_p0 = scmp.lt.u32.totalorder %s1056_s10, %s1361_s11 }
  0x37   : > { %p1058_p9 = pnand %p1057_p7, %p939_p5  ;;  %p1063_p13 = por %p1062_p12, %p1061_p11 }
  0x39   : > { %p1059_p10 = pneg %p1058_p9  ;;  %p1065_p4 = por %p1064_p0, %p1063_p13 }
  0x3b   : > { %p1066_p3 = pnand %p1065_p4, %p1059_p10 }
  0x3d   : > { %1069 = shalt.err (!%p1066_p3)
}
  0x3e   : > { %s1070_s28 = scalar_lea.vmem %s1363_s30, %s1350_s17  ;;  %s1224_s4 = smov [#allocation4]  }
  0x3f   : > { %p1071_p7 = scmp.ne.s32.totalorder %s1363_s30, %s1070_s28  ;;  %s1074_s5 = sshll.u32 %s1224_s4, 4  ;;  %s1075_s5 = int_to_ptr.vmem [resolvable:$false] %s1074_s5 }
  0x40   : > { %s1076_s24 = scalar_lea.vmem %s1075_s5, 17408  ;;  %p1077_p1 = scmp.lt.s32.totalorder %s1363_s30, %s1075_s5 }
  0x41   : > { %p1072_p9 = pnand %p1071_p7, %p939_p5  ;;  %p1078_p11 = scmp.lt.s32.totalorder %s1076_s24, %s1070_s28 }
  0x43   : > { %p1073_p2 = pneg %p1072_p9  ;;  %p1079_p12 = por %p1078_p11, %p1077_p1 }
  0x45   : > { %p1080_p13 = pnand %p1079_p12, %p1073_p2 }
  0x47   : > { %1083 = shalt.err (!%p1080_p13)
}
  0x48   : > { %s1225_s10 = smov 512   ;;  %s1226_s12 = smov 32  }
  0x49   : > { %171 = dma.hbm_to_vmem [thread:$0]  (%p939_p5), %s1361_s11, %s1350_s17, %s1363_s30, %s1353_s23, %s1225_s10, %s1225_s10, %s1226_s12  }
  0x4a PF: > { %174 = sbr.rel (!%p1312_p6) target bundleno = 109 (0x6d), region = 24  ;;  %s175_s13 = sand.u32 (%p1312_p6), 1, %s1210_s19  }
  0x4b   : > { %s183_s22 = smul.u32 (%p1312_p6), 17, %s1303_s26  ;;  %s1397_s24 = scalar_lea.sflag (%p1312_p6), [#allocation8], %s175_s13 }
  0x4c   : > { %s968_s25 = smul.u32 (%p1312_p6), 544, %s175_s13 }
  0x4d   : > { %s184_s28 = ssub.s32 (%p1312_p6), 33, %s183_s22 }
  0x4e   : > { %p185_p1 = scmp.lt.s32.totalorder (%p1312_p6), %s184_s28, 17  ;;  %s179_s17 = scalar_lea.vmem (%p1312_p6), [#allocation7], %s968_s25 }
  0x51   : > { %s1993_s28 = smov (!%p185_p1, %s184_s28), 17 }
  0x52   : > { %s1394_s4 = sshll.u32 %s1993_s28, 9 }
  0x53   : > { %s190_s5 = ssub.s32 8704, %s1394_s4 }
  0x54   : > { %191 = vsyncadd %s1397_s24, %s190_s5  ;;  %p946_p6 = scmp.ne.s32.totalorder %s1394_s4, 0  ;;  %s966_s27 = smul.u32 8704, %s1303_s26 }
  0x55   : > { %s197_s23 = sshll.u32 %s179_s17, 4  ;;  %s1088_s26 = scalar_lea.hbm %s1957_s2, 16896  ;;  %s1407_s23 = int_to_ptr.vmem [resolvable:$true] %s197_s23 }
  0x56   : > { %s1405_s10 = scalar_lea.hbm %s1957_s2, %s966_s27 }
  0x57   : > { %s1084_s12 = scalar_lea.hbm %s1405_s10, %s1394_s4  ;;  %p1089_p10 = scmp.lt.u32.totalorder %s1405_s10, %s1957_s2 }
  0x58   : > { %p1085_p2 = scmp.ne.s32.totalorder %s1405_s10, %s1084_s12  ;;  %p1090_p0 = scmp.lt.u32.totalorder %s1088_s26, %s1084_s12 }
  0x59   : > { %p1092_p7 = scmp.lt.u32.totalorder %s1084_s12, %s1405_s10 }
  0x5a   : > { %p1086_p3 = pnand %p1085_p2, %p946_p6  ;;  %p1091_p4 = por %p1090_p0, %p1089_p10 }
  0x5c   : > { %p1087_p5 = pneg %p1086_p3  ;;  %p1093_p9 = por %p1092_p7, %p1091_p4 }
  0x5e   : > { %p1094_p11 = pnand %p1093_p9, %p1087_p5 }
  0x60   : > { %1097 = shalt.err (!%p1094_p11)
}
  0x61   : > { %s1098_s5 = scalar_lea.vmem %s1407_s23, %s1394_s4  ;;  %s1227_s17 = smov [#allocation7]  }
  0x62   : > { %p1099_p12 = scmp.ne.s32.totalorder %s1407_s23, %s1098_s5  ;;  %s1102_s27 = sshll.u32 %s1227_s17, 4  ;;  %s1103_s27 = int_to_ptr.vmem [resolvable:$false] %s1102_s27 }
  0x63   : > { %s1104_s30 = scalar_lea.vmem %s1103_s27, 17408  ;;  %p1105_p2 = scmp.lt.s32.totalorder %s1407_s23, %s1103_s27 }
  0x64   : > { %p1100_p13 = pnand %p1099_p12, %p946_p6  ;;  %p1106_p3 = scmp.lt.s32.totalorder %s1104_s30, %s1098_s5 }
  0x66   : > { %p1101_p1 = pneg %p1100_p13  ;;  %p1107_p10 = por %p1106_p3, %p1105_p2 }
  0x68   : > { %p1108_p0 = pnand %p1107_p10, %p1101_p1 }
  0x6a   : > { %1111 = shalt.err (!%p1108_p0)
}
  0x6b   : > { %s1228_s11 = smov 512   ;;  %s1229_s12 = smov 32  }
  0x6c   : > { %203 = dma.hbm_to_vmem [thread:$0]  (%p946_p6), %s1405_s10, %s1394_s4, %s1407_s23, %s1397_s24, %s1228_s11, %s1228_s11, %s1229_s12  }
  0x6d PF: > { %p951_p5 = scmp.ge.s32.totalorder %s1222_s21, 1  ;;  %p205_p4 = scmp.lt.s32.totalorder %s1222_s21, 3 }
  0x6f   : > { %p206_p7 = pnand %p951_p5, %p205_p4 }
  0x70   : > { %s211_s13 = sand.u32 (!%p206_p7), 1, %s1206_s18  }
  0x71   : > { %209 = sbr.rel (%p206_p7) target bundleno = 255 (0xff), region = 28  ;;  %s212_s26 = scalar_lea.sflag (!%p206_p7), [#allocation5], %s211_s13 }
  0x72   : > { %s969_s22 = smul.u32 (!%p206_p7), 544, %s211_s13 }
  0x74   : > { %s1437_s25 = scalar_lea.vmem (!%p206_p7), [#allocation4], %s969_s22 }
  0x78   : > { %1177 = dma.done.wait (%p1317_p8), %s212_s26, 8704  }
  0x79   : > { %1179 = vsyncadd (%p1317_p8), %s212_s26, 4294958592  ;;  %s221_s4 = scalar_lea.sflag [#allocation8], %s211_s13  ;;  %s1443_s24 = scalar_lea.vmem [#allocation7], %s969_s22 }
  0x7a   : > { %1181 = dma.done.wait (%p1317_p8), %s221_s4, 8704  }
  0x7b   : > { %1183 = vsyncadd (%p1317_p8), %s221_s4, 4294958592  ;;  %v620_v0 = vlaneseq  ;;  %s276_s23 = sld [smem:[#allocation3]]  ;;  %s619_s10 = smul.u32 136, %s1214_s20  ;;  %v277_v2 = vld [vmem:[%s1437_s25] sm:$0xff] }
  0x7c   : > { %v281_v3 = vld [vmem:[%s1437_s25 + $0x20] sm:$0xff]  ;;  %s247_s29 = sand.u32 1, %s1194_s15   ;;  %s964_s17 = sshll.u32 %s1214_s20, 9 }
  0x7d   : > { %v621_v1 = vshrl.u32 %v620_v0, 7  ;;  %v345_v4 = vld [vmem:[%s1443_s24] sm:$0xff]  ;;  %v638_v8 = vstv %s619_s10  ;;  %s952_s28 = sshll.u32 %s247_s29, 5  ;;  %s1895_s12 = scalar_lea.hbm %s1958_s3, %s964_s17 }
  0x7e   : > { %v349_v5 = vld [vmem:[%s1443_s24 + $0x20] sm:$0xff]  ;;  %v413_v19 = vsub.f32 %v277_v2, %v345_v4  ;;  %s1716_s5 = scalar_lea.vmem [#allocation9], %s952_s28  ;;  %s818_s13 = scalar_lea.sflag [#allocation6], %s247_s29 }
  0x7f   : > { %v622_v6 = vadd.s32 8, %v621_v1  ;;  %v623_v7 = vadd.s32 16, %v621_v1  ;;  %v624_v9 = vadd.s32 24, %v621_v1  ;;  %v625_v10 = vadd.s32 32, %v621_v1  ;;  %v285_v13 = vld [vmem:[%s1437_s25 + $0x40] sm:$0xff]  ;;  %s832_s27 = sshll.u32 %s1716_s5, 4  ;;  %s1897_s27 = int_to_ptr.vmem [resolvable:$true] %s832_s27 }
  0x80   : > { %v626_v11 = vadd.s32 40, %v621_v1  ;;  %v627_v12 = vadd.s32 48, %v621_v1  ;;  %v353_v14 = vld [vmem:[%s1443_s24 + $0x40] sm:$0xff]  ;;  %v628_v15 = vadd.s32 56, %v621_v1  ;;  %v629_v16 = vadd.s32 64, %v621_v1  ;;  %s1112_s22 = scalar_lea.vmem %s1897_s27, 512 }
  0x81   : > { %v630_v17 = vadd.s32 72, %v621_v1  ;;  %v631_v18 = vadd.s32 80, %v621_v1  ;;  %v417_v20 = vsub.f32 %v281_v3, %v349_v5  ;;  %v632_v21 = vadd.s32 88, %v621_v1  ;;  %v289_v23 = vld [vmem:[%s1437_s25 + $0x60] sm:$0xff]  ;;  %p1113_p8 = scmp.ne.s32.totalorder %s1897_s27, %s1112_s22  ;;  %p1976_p6 = scmp.ne.s32.totalorder %s1968_s8, 0 }
  0x82   : > { %v633_v22 = vadd.s32 96, %v621_v1  ;;  %v357_v24 = vld [vmem:[%s1443_s24 + $0x60] sm:$0xff]  ;;  %v1458_v25 = vstv %s276_s23  ;;  %v634_v26 = vadd.s32 104, %v621_v1  ;;  %v635_v27 = vadd.s32 112, %v621_v1  ;;  %s1230_s20 = smov [#allocation9]  }
  0x83   : > { %v636_v28 = vadd.s32 120, %v621_v1  ;;  %v421_v29 = vsub.f32 %v285_v13, %v353_v14  ;;  %v637_v30 = vadd.s32 128, %v621_v1  ;;  %v1460_v31 = vadd.s32 %v638_v8, %v621_v1  ;;  %v293_v33 = vld [vmem:[%s1437_s25 + $0x80] sm:$0xff]  ;;  %p1114_p9 = pnand %p1113_p8, %p1976_p6  ;;  %s1116_s26 = sshll.u32 %s1230_s20, 4  ;;  %s1117_s26 = int_to_ptr.vmem [resolvable:$false] %s1116_s26 }
  0x84   : > { %v1462_v32 = vadd.s32 %v638_v8, %v622_v6  ;;  %v361_v34 = vld [vmem:[%s1443_s24 + $0x80] sm:$0xff]  ;;  %v1466_v35 = vadd.s32 %v638_v8, %v623_v7  ;;  %v1468_v36 = vadd.s32 %v638_v8, %v624_v9  ;;  %v1470_v37 = vadd.s32 %v638_v8, %v625_v10  ;;  %p1119_p12 = scmp.lt.s32.totalorder %s1897_s27, %s1117_s26 }
  0x85   : > { %v1472_v38 = vadd.s32 %v638_v8, %v626_v11  ;;  %v425_v39 = vsub.f32 %v289_v23, %v357_v24  ;;  %v482_v40 = vadd.f32 %v1458_v25, %v413_v19  ;;  %v486_v41 = vadd.f32 %v1458_v25, %v417_v20  ;;  %v297_v43 = vld [vmem:[%s1437_s25 + $0xa0] sm:$0xff]  ;;  %p1115_p11 = pneg %p1114_p9 }
  0x86   : > { %v1476_v42 = vadd.s32 %v638_v8, %v627_v12  ;;  %v365_v44 = vld [vmem:[%s1443_s24 + $0xa0] sm:$0xff]  ;;  %v1480_v45 = vadd.s32 %v638_v8, %v628_v15  ;;  %v1482_v46 = vadd.s32 %v638_v8, %v629_v16  ;;  %v1484_v47 = vadd.s32 %v638_v8, %v630_v17 }
  0x87   : > { %v1486_v48 = vadd.s32 %v638_v8, %v631_v18  ;;  %v301_v49 = vld [vmem:[%s1437_s25 + $0xc0] sm:$0xff]  ;;  %v429_v51 = vsub.f32 %v293_v33, %v361_v34  ;;  %v490_v52 = vadd.f32 %v1458_v25, %v421_v29  ;;  %v1491_v53 = vadd.s32 %v638_v8, %v632_v21 }
  0x88   : > { %v305_v50 = vld [vmem:[%s1437_s25 + $0xe0] sm:$0xff]  ;;  %v1493_v54 = vadd.s32 %v638_v8, %v633_v22  ;;  %v1498_v58 = vadd.s32 %v638_v8, %v634_v26  ;;  %v1500_v59 = vadd.s32 %v638_v8, %v635_v27  ;;  %v1502_v60 = vadd.s32 %v638_v8, %v636_v28 }
  0x89   : > { %v309_v55 = vld [vmem:[%s1437_s25 + $0x100] sm:$0xff]  ;;  %v1504_v61 = vadd.s32 %v638_v8, %v637_v30  ;;  %v433_v4 = vsub.f32 %v297_v43, %v365_v44  ;;  %v494_v5 = vadd.f32 %v1458_v25, %v425_v39  ;;  %v550_v6 = vmax.f32 %v482_v40, 0.0 }
  0x8a   : > { %v313_v56 = vld [vmem:[%s1437_s25 + $0x120] sm:$0xff]  ;;  %v554_v7 = vmax.f32 %v486_v41, 0.0  ;;  %vm656_vm0 = vcmp.lt.s32.totalorder %v1460_v31, 257  ;;  %vm657_vm1 = vcmp.lt.s32.totalorder %v1462_v32, 257  ;;  %vm658_vm2 = vcmp.lt.s32.totalorder %v1466_v35, 257 }
  0x8b   : > { %v369_v57 = vld [vmem:[%s1443_s24 + $0xc0] sm:$0xff]  ;;  %vm659_vm3 = vcmp.lt.s32.totalorder %v1468_v36, 257  ;;  %v498_v14 = vadd.f32 %v1458_v25, %v429_v51  ;;  %v558_v15 = vmax.f32 %v490_v52, 0.0  ;;  %vm660_vm4 = vcmp.lt.s32.totalorder %v1470_v37, 257  ;;  %v332_v37 = vld [vmem:[%s1437_s25 + $0x1b8] sm:$0xff] }
  0x8c   : > { %v317_v62 = vld [vmem:[%s1437_s25 + $0x140] sm:$0xff]  ;;  %v437_v13 = vsub.f32 %v301_v49, %v369_v57  ;;  %vm661_vm5 = vcmp.lt.s32.totalorder %v1472_v38, 257  ;;  %v502_v26 = vadd.f32 %v1458_v25, %v433_v4  ;;  %v562_v27 = vmax.f32 %v494_v5, 0.0  ;;  %v282_v4 = vld [vmem:[%s1437_s25 + $0x28] sm:$0xff]  ;;  %v404_v38 = vld [vmem:[%s1443_s24 + $0x1d8] sm:$0xff] }
  0x8d   : > { %v321_v63 = vld [vmem:[%s1437_s25 + $0x160] sm:$0xff]  ;;  %v673_v28 = vsel %vm656_vm0, %v550_v6, 0.0  ;;  %v677_v29 = vsel %vm657_vm1, %v554_v7, 0.0  ;;  %v566_v43 = vmax.f32 %v498_v14, 0.0  ;;  %v681_v44 = vsel %vm658_vm2, %v558_v15, 0.0  ;;  %v346_v5 = vld [vmem:[%s1443_s24 + $0x8] sm:$0xff] }
  0x8e   : > { %v325_v0 = vld [vmem:[%s1437_s25 + $0x180] sm:$0xff]  ;;  %v506_v41 = vadd.f32 %v1458_v25, %v437_v13  ;;  %v745_v52 = vadd.f32 %v677_v29, %v673_v28  ;;  %v570_v57 = vmax.f32 %v502_v26, 0.0  ;;  %v350_v6 = vld [vmem:[%s1443_s24 + $0x28] sm:$0xff]  ;;  %vm662_vm6 = vcmp.lt.s32.totalorder %v1476_v42, 257 }
  0x8f   : > { %v373_v1 = vld [vmem:[%s1443_s24 + $0xe0] sm:$0xff]  ;;  %v286_v14 = vld [vmem:[%s1437_s25 + $0x48] sm:$0xff]  ;;  %vm663_vm7 = vcmp.lt.s32.totalorder %v1480_v45, 257  ;;  %vm1964_vm8 = vcmp.lt.s32.totalorder %v1482_v46, 257  ;;  %vm1963_vm9 = vcmp.lt.s32.totalorder %v1484_v47, 257  ;;  %vm1962_vm10 = vcmp.lt.s32.totalorder %v1486_v48, 257 }
  0x90   : > { %v377_v2 = vld [vmem:[%s1443_s24 + $0x100] sm:$0xff]  ;;  %v441_v19 = vsub.f32 %v305_v50, %v373_v1  ;;  %v354_v15 = vld [vmem:[%s1443_s24 + $0x48] sm:$0xff]  ;;  %vm667_vm11 = vcmp.lt.s32.totalorder %v1491_v53, 257  ;;  %vm668_vm12 = vcmp.lt.s32.totalorder %v1493_v54, 257  ;;  %vm669_vm13 = vcmp.lt.s32.totalorder %v1498_v58, 257 }
  0x91   : > { %v381_v3 = vld [vmem:[%s1443_s24 + $0x120] sm:$0xff]  ;;  %v445_v20 = vsub.f32 %v309_v55, %v377_v2  ;;  %v422_v29 = vsub.f32 %v286_v14, %v354_v15  ;;  %vm670_vm14 = vcmp.lt.s32.totalorder %v1500_v59, 257  ;;  %vm671_vm15 = vcmp.lt.s32.totalorder %v1502_v60, 257 }
  0x92   : > { %v329_v9 = vld [vmem:[%s1437_s25 + $0x1a0] sm:$0xff]  ;;  %v449_v21 = vsub.f32 %v313_v56, %v381_v3  ;;  %v510_v51 = vadd.f32 %v1458_v25, %v441_v19  ;;  %v746_v3 = vadd.f32 %v745_v52, %v681_v44  ;;  %v418_v19 = vsub.f32 %v282_v4, %v350_v6  ;;  %v370_v4 = vld [vmem:[%s1443_s24 + $0xc8] sm:$0xff] }
  0x93   : > { %v385_v8 = vld [vmem:[%s1443_s24 + $0x140] sm:$0xff]  ;;  %v514_v55 = vadd.f32 %v1458_v25, %v445_v20  ;;  %v374_v6 = vld [vmem:[%s1443_s24 + $0xe8] sm:$0xff] }
  0x94   : > { %v389_v10 = vld [vmem:[%s1443_s24 + $0x160] sm:$0xff]  ;;  %v453_v30 = vsub.f32 %v317_v62, %v385_v8  ;;  %v518_v56 = vadd.f32 %v1458_v25, %v449_v21  ;;  %v685_v62 = vsel %vm659_vm3, %v562_v27, 0.0  ;;  %v574_v8 = vmax.f32 %v506_v41, 0.0 }
  0x95   : > { %v393_v11 = vld [vmem:[%s1443_s24 + $0x180] sm:$0xff]  ;;  %v457_v33 = vsub.f32 %v321_v63, %v389_v10  ;;  %v278_v63 = vld [vmem:[%s1437_s25 + $0x8] sm:$0xff]  ;;  %v689_v10 = vsel %vm660_vm4, %v566_v43, 0.0  ;;  %v747_v13 = vadd.f32 %v746_v3, %v685_v62  ;;  %v582_v20 = vmax.f32 %v514_v55, 0.0 }
  0x96   : > { %v397_v12 = vld [vmem:[%s1443_s24 + $0x1a0] sm:$0xff]  ;;  %v461_v34 = vsub.f32 %v325_v0, %v393_v11  ;;  %v1546_v0 = vadd.f32 %v1458_v25, %v453_v30  ;;  %v586_v21 = vmax.f32 %v518_v56, 0.0  ;;  %v697_v28 = vsel %vm662_vm6, %v574_v8, 0.0  ;;  %v298_v55 = vld [vmem:[%s1437_s25 + $0xa8] sm:$0xff] }
  0x97   : > { %v333_v16 = vld [vmem:[%s1437_s25 + $0x1c0] sm:$0xff]  ;;  %v465_v39 = vsub.f32 %v329_v9, %v397_v12  ;;  %v1549_v1 = vadd.f32 %v1458_v25, %v457_v33  ;;  %v487_v44 = vadd.f32 %v1458_v25, %v418_v19  ;;  %v366_v56 = vld [vmem:[%s1443_s24 + $0xa8] sm:$0xff]  ;;  %v705_v62 = vsel %vm1964_vm8, %v582_v20, 0.0 }
  0x98   : > { %v337_v17 = vld [vmem:[%s1437_s25 + $0x1e0] sm:$0xff]  ;;  %v1552_v2 = vadd.f32 %v1458_v25, %v461_v34  ;;  %v590_v26 = vmax.f32 %v1546_v0, 0.0  ;;  %v294_v34 = vld [vmem:[%s1437_s25 + $0x88] sm:$0xff]  ;;  %v491_v0 = vadd.f32 %v1458_v25, %v422_v29 }
  0x99   : > { %v401_v18 = vld [vmem:[%s1443_s24 + $0x1c0] sm:$0xff]  ;;  %v1558_v7 = vadd.f32 %v1458_v25, %v465_v39  ;;  %v594_v27 = vmax.f32 %v1549_v1, 0.0  ;;  %v362_v39 = vld [vmem:[%s1443_s24 + $0x88] sm:$0xff]  ;;  %v709_v1 = vsel %vm1963_vm9, %v586_v21, 0.0 }
  0x9a   : > { %v341_v22 = vld [vmem:[%s1437_s25 + $0x200] sm:$0xff]  ;;  %v469_v40 = vsub.f32 %v333_v16, %v401_v18  ;;  %v578_v16 = vmax.f32 %v510_v51, 0.0  ;;  %v414_v18 = vsub.f32 %v278_v63, %v346_v5  ;;  %v598_v30 = vmax.f32 %v1552_v2, 0.0  ;;  %v302_v3 = vld [vmem:[%s1437_s25 + $0xc8] sm:$0xff] }
  0x9b   : > { %v405_v23 = vld [vmem:[%s1443_s24 + $0x1e0] sm:$0xff]  ;;  %v430_v63 = vsub.f32 %v294_v34, %v362_v39  ;;  %v306_v5 = vld [vmem:[%s1437_s25 + $0xe8] sm:$0xff]  ;;  %v559_v15 = vmax.f32 %v491_v0, 0.0 }
  0x9c   : > { %v409_v24 = vld [vmem:[%s1443_s24 + $0x200] sm:$0xff]  ;;  %v473_v49 = vsub.f32 %v337_v17, %v405_v23  ;;  %v1561_v9 = vadd.f32 %v1458_v25, %v469_v40  ;;  %v693_v17 = vsel %vm661_vm5, %v570_v57, 0.0  ;;  %v290_v23 = vld [vmem:[%s1437_s25 + $0x68] sm:$0xff]  ;;  %v701_v40 = vsel %vm663_vm7, %v578_v16, 0.0 }
  0x9d   : > { %v477_v50 = vsub.f32 %v341_v22, %v409_v24  ;;  %v748_v22 = vadd.f32 %v747_v13, %v689_v10  ;;  %v358_v24 = vld [vmem:[%s1443_s24 + $0x68] sm:$0xff]  ;;  %v483_v43 = vadd.f32 %v1458_v25, %v414_v18  ;;  %v555_v10 = vmax.f32 %v487_v44, 0.0 }
  0x9e   : > { %v1566_v11 = vadd.f32 %v1458_v25, %v473_v49  ;;  %v426_v41 = vsub.f32 %v290_v23, %v358_v24  ;;  %v602_v49 = vmax.f32 %v1558_v7, 0.0  ;;  %v434_v7 = vsub.f32 %v298_v55, %v366_v56  ;;  %v310_v18 = vld [vmem:[%s1437_s25 + $0x108] sm:$0xff] }
  0x9f   : > { %v1569_v12 = vadd.f32 %v1458_v25, %v477_v50  ;;  %v749_v33 = vadd.f32 %v748_v22, %v693_v17  ;;  %v606_v50 = vmax.f32 %v1561_v9, 0.0  ;;  %v551_v8 = vmax.f32 %v483_v43, 0.0  ;;  %v378_v19 = vld [vmem:[%s1443_s24 + $0x108] sm:$0xff] }
  0xa0   : > { %v610_v51 = vmax.f32 %v1566_v11, 0.0  ;;  %v495_v9 = vadd.f32 %v1458_v25, %v426_v41  ;;  %v438_v13 = vsub.f32 %v302_v3, %v370_v4  ;;  %v499_v14 = vadd.f32 %v1458_v25, %v430_v63  ;;  %v314_v29 = vld [vmem:[%s1437_s25 + $0x128] sm:$0xff] }
  0xa1   : > { %v750_v52 = vadd.f32 %v749_v33, %v697_v28  ;;  %v614_v57 = vmax.f32 %v1569_v12, 0.0  ;;  %v713_v12 = vsel %vm1962_vm10, %v590_v26, 0.0  ;;  %v717_v16 = vsel %vm667_vm11, %v594_v27, 0.0  ;;  %v382_v33 = vld [vmem:[%s1443_s24 + $0x128] sm:$0xff] }
  0xa2   : > { %v442_v20 = vsub.f32 %v306_v5, %v374_v6  ;;  %v503_v21 = vadd.f32 %v1458_v25, %v434_v7  ;;  %v563_v22 = vmax.f32 %v495_v9, 0.0  ;;  %v674_v23 = vsel %vm656_vm0, %v551_v8, 0.0  ;;  %v318_v34 = vld [vmem:[%s1437_s25 + $0x148] sm:$0xff] }
  0xa3   : > { %v751_v2 = vadd.f32 %v750_v52, %v701_v40  ;;  %v678_v24 = vsel %vm657_vm1, %v555_v10, 0.0  ;;  %vm672_vm10 = vcmp.lt.s32.totalorder %v1504_v61, 257  ;;  %v721_v26 = vsel %vm668_vm12, %v598_v30, 0.0  ;;  %v386_v39 = vld [vmem:[%s1443_s24 + $0x148] sm:$0xff] }
  0xa4   : > { %v725_v27 = vsel %vm669_vm13, %v602_v49, 0.0  ;;  %v446_v40 = vsub.f32 %v310_v18, %v378_v19  ;;  %v507_v41 = vadd.f32 %v1458_v25, %v438_v13  ;;  %v567_v43 = vmax.f32 %v499_v14, 0.0  ;;  %v322_v55 = vld [vmem:[%s1437_s25 + $0x168] sm:$0xff] }
  0xa5   : > { %v752_v11 = vadd.f32 %v751_v2, %v705_v62  ;;  %v682_v44 = vsel %vm658_vm2, %v559_v15, 0.0  ;;  %v729_v30 = vsel %vm670_vm14, %v606_v50, 0.0  ;;  %v733_v49 = vsel %vm671_vm15, %v610_v51, 0.0  ;;  %v1644_v56 = vld [vmem:[%s1437_s25 + $0x188] sm:$0xff] }
  0xa6   : > { %v390_v62 = vld [vmem:[%s1443_s24 + $0x168] sm:$0xff]  ;;  %v761_v63 = vadd.f32 %v678_v24, %v674_v23  ;;  %v450_v50 = vsub.f32 %v314_v29, %v382_v33  ;;  %v511_v3 = vadd.f32 %v1458_v25, %v442_v20  ;;  %v571_v51 = vmax.f32 %v503_v21, 0.0 }
  0xa7   : > { %v753_v17 = vadd.f32 %v752_v11, %v709_v1  ;;  %v1648_v0 = vld [vmem:[%s1437_s25 + $0x1a8] sm:$0xff]  ;;  %v686_v4 = vsel %vm659_vm3, %v563_v22, 0.0  ;;  %v737_v5 = vsel %vm672_vm10, %v614_v57, 0.0  ;;  %v454_v8 = vsub.f32 %v318_v34, %v386_v39  ;;  %v279_v11 = vld [vmem:[%s1437_s25 + $0x10] sm:$0xff] }
  0xa8   : > { %v1651_v1 = vld [vmem:[%s1443_s24 + $0x188] sm:$0xff]  ;;  %v762_v10 = vadd.f32 %v761_v63, %v682_v44  ;;  %v515_v13 = vadd.f32 %v1458_v25, %v446_v40  ;;  %v575_v14 = vmax.f32 %v507_v41, 0.0  ;;  %v690_v15 = vsel %vm660_vm4, %v567_v43, 0.0  ;;  %v347_v57 = vld [vmem:[%s1443_s24 + $0x10] sm:$0xff] }
  0xa9   : > { %v754_v28 = vadd.f32 %v753_v17, %v713_v12  ;;  %v1654_v2 = vld [vmem:[%s1443_s24 + $0x1a8] sm:$0xff]  ;;  %v458_v12 = vsub.f32 %v322_v55, %v390_v62  ;;  %v351_v17 = vld [vmem:[%s1443_s24 + $0x30] sm:$0xff]  ;;  %v462_v22 = vsub.f32 %v1644_v56, %v1651_v1  ;;  %v579_v29 = vmax.f32 %v511_v3, 0.0 }
  0xaa   : > { %v334_v7 = vld [vmem:[%s1437_s25 + $0x1c8] sm:$0xff]  ;;  %v466_v23 = vsub.f32 %v1648_v0, %v1654_v2  ;;  %v763_v24 = vadd.f32 %v762_v10, %v686_v4  ;;  %v694_v33 = vsel %vm661_vm5, %v571_v51, 0.0  ;;  %v287_v34 = vld [vmem:[%s1437_s25 + $0x50] sm:$0xff]  ;;  %v523_v62 = vadd.f32 %v1458_v25, %v454_v8 }
  0xab   : > { %v755_v52 = vadd.f32 %v754_v28, %v717_v16  ;;  %v402_v9 = vld [vmem:[%s1443_s24 + $0x1c8] sm:$0xff]  ;;  %v283_v16 = vld [vmem:[%s1437_s25 + $0x30] sm:$0xff]  ;;  %v583_v63 = vmax.f32 %v515_v13, 0.0  ;;  %v698_v0 = vsel %vm662_vm6, %v575_v14, 0.0  ;;  %v527_v3 = vadd.f32 %v1458_v25, %v458_v12 }
  0xac   : > { %v1671_v19 = vld [vmem:[%s1437_s25 + $0x1e8] sm:$0xff]  ;;  %v470_v28 = vsub.f32 %v334_v7, %v402_v9  ;;  %v355_v39 = vld [vmem:[%s1443_s24 + $0x50] sm:$0xff]  ;;  %v764_v41 = vadd.f32 %v763_v24, %v690_v15  ;;  %v419_v55 = vsub.f32 %v283_v16, %v351_v17  ;;  %v702_v4 = vsel %vm663_vm7, %v579_v29, 0.0 }
  0xad   : > { %v756_v6 = vadd.f32 %v755_v52, %v721_v26  ;;  %v1674_v20 = vld [vmem:[%s1437_s25 + $0x208] sm:$0xff]  ;;  %v291_v43 = vld [vmem:[%s1437_s25 + $0x70] sm:$0xff]  ;;  %v415_v52 = vsub.f32 %v279_v11, %v347_v57  ;;  %v531_v15 = vadd.f32 %v1458_v25, %v462_v22  ;;  %v535_v12 = vadd.f32 %v1458_v25, %v466_v23 }
  0xae   : > { %v406_v21 = vld [vmem:[%s1443_s24 + $0x1e8] sm:$0xff]  ;;  %v359_v44 = vld [vmem:[%s1443_s24 + $0x70] sm:$0xff]  ;;  %v765_v2 = vadd.f32 %v764_v41, %v694_v33  ;;  %v488_v14 = vadd.f32 %v1458_v25, %v419_v55  ;;  %v591_v16 = vmax.f32 %v523_v62, 0.0  ;;  %v706_v57 = vsel %vm1964_vm8, %v583_v63, 0.0 }
  0xaf   : > { %v757_v18 = vadd.f32 %v756_v6, %v725_v27  ;;  %v410_v26 = vld [vmem:[%s1443_s24 + $0x208] sm:$0xff]  ;;  %v519_v27 = vadd.f32 %v1458_v25, %v450_v50  ;;  %v474_v56 = vsub.f32 %v1671_v19, %v406_v21  ;;  %v423_v50 = vsub.f32 %v287_v34, %v355_v39  ;;  %v295_v6 = vld [vmem:[%s1437_s25 + $0x90] sm:$0xff] }
  0xb0   : > { %v478_v1 = vsub.f32 %v1674_v20, %v410_v26  ;;  %v363_v7 = vld [vmem:[%s1443_s24 + $0x90] sm:$0xff]  ;;  %v427_v9 = vsub.f32 %v291_v43, %v359_v44  ;;  %v766_v10 = vadd.f32 %v765_v2, %v698_v0  ;;  %v539_v19 = vadd.f32 %v1458_v25, %v470_v28 }
  0xb1   : > { %v758_v40 = vadd.f32 %v757_v18, %v729_v30  ;;  %v587_v51 = vmax.f32 %v519_v27, 0.0  ;;  %v299_v11 = vld [vmem:[%s1437_s25 + $0xb0] sm:$0xff]  ;;  %v431_v17 = vsub.f32 %v295_v6, %v363_v7  ;;  %v492_v18 = vadd.f32 %v1458_v25, %v423_v50 }
  0xb2   : > { %v367_v13 = vld [vmem:[%s1443_s24 + $0xb0] sm:$0xff]  ;;  %v595_v20 = vmax.f32 %v527_v3, 0.0  ;;  %v496_v33 = vadd.f32 %v1458_v25, %v427_v9  ;;  %v556_v28 = vmax.f32 %v488_v14, 0.0  ;;  %v543_v39 = vadd.f32 %v1458_v25, %v474_v56 }
  0xb3   : > { %v759_v30 = vadd.f32 %v758_v40, %v733_v49  ;;  %v484_v49 = vadd.f32 %v1458_v25, %v415_v52  ;;  %v710_v21 = vsel %vm1963_vm9, %v587_v51, 0.0  ;;  %v303_v24 = vld [vmem:[%s1437_s25 + $0xd0] sm:$0xff]  ;;  %v435_v23 = vsub.f32 %v299_v11, %v367_v13 }
  0xb4   : > { %v371_v22 = vld [vmem:[%s1443_s24 + $0xd0] sm:$0xff]  ;;  %v547_v40 = vadd.f32 %v1458_v25, %v478_v1  ;;  %v599_v41 = vmax.f32 %v531_v15, 0.0  ;;  %vm1970_vm9 = vcmp.lt.s32.totalorder %v1486_v48, 257  ;;  %v500_v63 = vadd.f32 %v1458_v25, %v431_v17 }
  0xb5   : > { %v760_v8 = vadd.f32 %v759_v30, %v737_v5  ;;  %v767_v5 = vadd.f32 %v766_v10, %v702_v4  ;;  %v307_v27 = vld [vmem:[%s1437_s25 + $0xf0] sm:$0xff]  ;;  %v552_v34 = vmax.f32 %v484_v49, 0.0  ;;  %v714_v43 = vsel %vm1970_vm9, %v591_v16, 0.0 }
  0xb6   : > { %v375_v29 = vld [vmem:[%s1443_s24 + $0xf0] sm:$0xff]  ;;  %v439_v62 = vsub.f32 %v303_v24, %v371_v22  ;;  %v560_v0 = vmax.f32 %v492_v18, 0.0  ;;  %v603_v30 = vmax.f32 %v535_v12, 0.0  ;;  %v718_v56 = vsel %vm667_vm11, %v595_v20, 0.0 }
  0xb7   : > { %813 = vst [vmem:[%s1716_s5] sm:$0xff] %v760_v8  ;;  %v768_v26 = vadd.f32 %v767_v5, %v706_v57  ;;  %v311_v52 = vld [vmem:[%s1437_s25 + $0x110] sm:$0xff]  ;;  %v443_v2 = vsub.f32 %v307_v27, %v375_v29  ;;  %v504_v1 = vadd.f32 %v1458_v25, %v435_v23  ;;  %v564_v4 = vmax.f32 %v496_v33, 0.0 }
  0xb8   : > { %v379_v55 = vld [vmem:[%s1443_s24 + $0x110] sm:$0xff]  ;;  %v675_v6 = vsel %vm656_vm0, %v552_v34, 0.0  ;;  %v679_v7 = vsel %vm657_vm1, %v556_v28, 0.0  ;;  %v607_v9 = vmax.f32 %v539_v19, 0.0  ;;  %v611_v8 = vmax.f32 %v543_v39, 0.0 }
  0xb9   : > { %v769_v44 = vadd.f32 %v768_v26, %v710_v21  ;;  %v315_v3 = vld [vmem:[%s1437_s25 + $0x130] sm:$0xff]  ;;  %v722_v10 = vsel %vm668_vm12, %v599_v41, 0.0  ;;  %v447_v11 = vsub.f32 %v311_v52, %v379_v55  ;;  %v508_v15 = vadd.f32 %v1458_v25, %v439_v62 }
  0xba   : > { %v383_v51 = vld [vmem:[%s1443_s24 + $0x130] sm:$0xff]  ;;  %v568_v12 = vmax.f32 %v500_v63, 0.0  ;;  %v683_v16 = vsel %vm658_vm2, %v560_v0, 0.0  ;;  %v615_v57 = vmax.f32 %v547_v40, 0.0  ;;  %v726_v5 = vsel %vm669_vm13, %v603_v30, 0.0  ;;  %v284_v0 = vld [vmem:[%s1437_s25 + $0x38] sm:$0xff] }
  0xbb   : > { %v770_v50 = vadd.f32 %v769_v44, %v714_v43  ;;  %v319_v49 = vld [vmem:[%s1437_s25 + $0x150] sm:$0xff]  ;;  %v451_v17 = vsub.f32 %v315_v3, %v383_v51  ;;  %v777_v18 = vadd.f32 %v679_v7, %v675_v6  ;;  %v512_v24 = vadd.f32 %v1458_v25, %v443_v2  ;;  %v280_v44 = vld [vmem:[%s1437_s25 + $0x18] sm:$0xff] }
  0xbc   : > { %v387_v14 = vld [vmem:[%s1443_s24 + $0x150] sm:$0xff]  ;;  %v572_v22 = vmax.f32 %v504_v1, 0.0  ;;  %v687_v23 = vsel %vm659_vm3, %v564_v4, 0.0  ;;  %v730_v26 = vsel %vm670_vm14, %v607_v9, 0.0  ;;  %v516_v33 = vadd.f32 %v1458_v25, %v447_v11  ;;  %v348_v30 = vld [vmem:[%s1443_s24 + $0x18] sm:$0xff] }
  0xbd   : > { %v771_v13 = vadd.f32 %v770_v50, %v718_v56  ;;  %v323_v20 = vld [vmem:[%s1437_s25 + $0x170] sm:$0xff]  ;;  %v455_v29 = vsub.f32 %v319_v49, %v387_v14  ;;  %v778_v34 = vadd.f32 %v777_v18, %v683_v16  ;;  %v576_v41 = vmax.f32 %v508_v15, 0.0  ;;  %v352_v56 = vld [vmem:[%s1443_s24 + $0x38] sm:$0xff] }
  0xbe   : > { %v391_v21 = vld [vmem:[%s1443_s24 + $0x170] sm:$0xff]  ;;  %v691_v43 = vsel %vm660_vm4, %v568_v12, 0.0  ;;  %v734_v52 = vsel %vm671_vm15, %v611_v8, 0.0  ;;  %v738_v55 = vsel %vm672_vm10, %v615_v57, 0.0  ;;  %v520_v51 = vadd.f32 %v1458_v25, %v451_v17  ;;  %v288_v11 = vld [vmem:[%s1437_s25 + $0x58] sm:$0xff] }
  0xbf   : > { %v772_v19 = vadd.f32 %v771_v13, %v722_v10  ;;  %v327_v27 = vld [vmem:[%s1437_s25 + $0x190] sm:$0xff]  ;;  %v459_v62 = vsub.f32 %v323_v20, %v391_v21  ;;  %v779_v63 = vadd.f32 %v778_v34, %v687_v23  ;;  %v580_v4 = vmax.f32 %v512_v24, 0.0  ;;  %v356_v13 = vld [vmem:[%s1443_s24 + $0x58] sm:$0xff] }
  0xc0   : > { %v331_v39 = vld [vmem:[%s1437_s25 + $0x1b0] sm:$0xff]  ;;  %v695_v6 = vsel %vm661_vm5, %v572_v22, 0.0  ;;  %v524_v9 = vadd.f32 %v1458_v25, %v455_v29  ;;  %v584_v8 = vmax.f32 %v516_v33, 0.0  ;;  %v699_v14 = vsel %vm662_vm6, %v576_v41, 0.0  ;;  %v360_v20 = vld [vmem:[%s1443_s24 + $0x78] sm:$0xff] }
  0xc1   : > { %v773_v28 = vadd.f32 %v772_v19, %v726_v5  ;;  %v395_v40 = vld [vmem:[%s1443_s24 + $0x190] sm:$0xff]  ;;  %v780_v10 = vadd.f32 %v779_v63, %v691_v43  ;;  %v416_v15 = vsub.f32 %v280_v44, %v348_v30  ;;  %v420_v12 = vsub.f32 %v284_v0, %v352_v56  ;;  %v292_v19 = vld [vmem:[%s1437_s25 + $0x78] sm:$0xff] }
  0xc2   : > { %v335_v1 = vld [vmem:[%s1437_s25 + $0x1d0] sm:$0xff]  ;;  %v463_v7 = vsub.f32 %v327_v27, %v395_v40  ;;  %v528_v17 = vadd.f32 %v1458_v25, %v459_v62  ;;  %v703_v27 = vsel %vm663_vm7, %v580_v4, 0.0  ;;  %v424_v29 = vsub.f32 %v288_v11, %v356_v13  ;;  %v296_v40 = vld [vmem:[%s1437_s25 + $0x98] sm:$0xff] }
  0xc3   : > { %v774_v2 = vadd.f32 %v773_v28, %v730_v26  ;;  %v399_v50 = vld [vmem:[%s1443_s24 + $0x1b0] sm:$0xff]  ;;  %v781_v18 = vadd.f32 %v780_v10, %v695_v6  ;;  %v588_v26 = vmax.f32 %v520_v51, 0.0  ;;  %v592_v34 = vmax.f32 %v524_v9, 0.0  ;;  %v364_v41 = vld [vmem:[%s1443_s24 + $0x98] sm:$0xff] }
  0xc4   : > { %v403_v3 = vld [vmem:[%s1443_s24 + $0x1d0] sm:$0xff]  ;;  %v467_v57 = vsub.f32 %v331_v39, %v399_v50  ;;  %v532_v33 = vadd.f32 %v1458_v25, %v463_v7  ;;  %v707_v28 = vsel %vm1964_vm8, %v584_v8, 0.0  ;;  %v428_v43 = vsub.f32 %v292_v19, %v360_v20  ;;  %v300_v30 = vld [vmem:[%s1437_s25 + $0xb8] sm:$0xff] }
  0xc5   : > { %v775_v49 = vadd.f32 %v774_v2, %v734_v52  ;;  %v339_v16 = vld [vmem:[%s1437_s25 + $0x1f0] sm:$0xff]  ;;  %v471_v5 = vsub.f32 %v335_v1, %v403_v3  ;;  %v782_v39 = vadd.f32 %v781_v18, %v699_v14  ;;  %v485_v44 = vadd.f32 %v1458_v25, %v416_v15  ;;  %v368_v56 = vld [vmem:[%s1443_s24 + $0xb8] sm:$0xff] }
  0xc6   : > { %v343_v24 = vld [vmem:[%s1437_s25 + $0x210] sm:$0xff]  ;;  %v489_v52 = vadd.f32 %v1458_v25, %v420_v12  ;;  %v536_v63 = vadd.f32 %v1458_v25, %v467_v57  ;;  %v596_v2 = vmax.f32 %v528_v17, 0.0  ;;  %vm1971_vm9 = vcmp.lt.s32.totalorder %v1484_v47, 257  ;;  %v304_v9 = vld [vmem:[%s1437_s25 + $0xd8] sm:$0xff] }
  0xc7   : > { %v776_v21 = vadd.f32 %v775_v49, %v738_v55  ;;  %v407_v22 = vld [vmem:[%s1443_s24 + $0x1f0] sm:$0xff]  ;;  %v783_v0 = vadd.f32 %v782_v39, %v703_v27  ;;  %v711_v1 = vsel %vm1971_vm9, %v588_v26, 0.0  ;;  %v432_v50 = vsub.f32 %v296_v40, %v364_v41  ;;  %v372_v8 = vld [vmem:[%s1443_s24 + $0xd8] sm:$0xff] }
  0xc8   : > { %v411_v23 = vld [vmem:[%s1443_s24 + $0x210] sm:$0xff]  ;;  %v475_v55 = vsub.f32 %v339_v16, %v407_v22  ;;  %v493_v3 = vadd.f32 %v1458_v25, %v424_v29  ;;  %v540_v51 = vadd.f32 %v1458_v25, %v471_v5  ;;  %v600_v4 = vmax.f32 %v532_v33, 0.0  ;;  %v308_v10 = vld [vmem:[%s1437_s25 + $0xf8] sm:$0xff] }
  0xc9   : > { %v479_v62 = vsub.f32 %v343_v24, %v411_v23  ;;  %814 = vst [vmem:[%s1716_s5 + $0x8] sm:$0xff] %v776_v21  ;;  %vm1972_vm8 = vcmp.lt.s32.totalorder %v1486_v48, 257  ;;  %v784_v7 = vadd.f32 %v783_v0, %v707_v28  ;;  %v376_v11 = vld [vmem:[%s1443_s24 + $0xf8] sm:$0xff]  ;;  %v436_v13 = vsub.f32 %v300_v30, %v368_v56 }
  0xca   : > { %v715_v6 = vsel %vm1972_vm8, %v592_v34, 0.0  ;;  %v497_v49 = vadd.f32 %v1458_v25, %v428_v43  ;;  %v553_v14 = vmax.f32 %v485_v44, 0.0  ;;  %v557_v15 = vmax.f32 %v489_v52, 0.0  ;;  %v312_v23 = vld [vmem:[%s1437_s25 + $0x118] sm:$0xff] }
  0xcb   : > { %v544_v12 = vadd.f32 %v1458_v25, %v475_v55  ;;  %v548_v16 = vadd.f32 %v1458_v25, %v479_v62  ;;  %v604_v57 = vmax.f32 %v536_v63, 0.0  ;;  %v785_v5 = vadd.f32 %v784_v7, %v711_v1  ;;  %v380_v26 = vld [vmem:[%s1443_s24 + $0x118] sm:$0xff] }
  0xcc   : > { %v719_v17 = vsel %vm667_vm11, %v596_v2, 0.0  ;;  %v440_v18 = vsub.f32 %v304_v9, %v372_v8  ;;  %v501_v19 = vadd.f32 %v1458_v25, %v432_v50  ;;  %v561_v20 = vmax.f32 %v493_v3, 0.0  ;;  %v316_v43 = vld [vmem:[%s1437_s25 + $0x138] sm:$0xff] }
  0xcd   : > { %v608_v21 = vmax.f32 %v540_v51, 0.0  ;;  %v723_v24 = vsel %vm668_vm12, %v600_v4, 0.0  ;;  %v786_v22 = vadd.f32 %v785_v5, %v715_v6  ;;  %v444_v27 = vsub.f32 %v308_v10, %v376_v11  ;;  %v384_v44 = vld [vmem:[%s1443_s24 + $0x138] sm:$0xff] }
  0xce   : > { %v505_v29 = vadd.f32 %v1458_v25, %v436_v13  ;;  %v565_v33 = vmax.f32 %v497_v49, 0.0  ;;  %v676_v34 = vsel %vm656_vm0, %v553_v14, 0.0  ;;  %v680_v28 = vsel %vm657_vm1, %v557_v15, 0.0  ;;  %v320_v30 = vld [vmem:[%s1437_s25 + $0x158] sm:$0xff]  ;;  %vm1974_vm1 = vmmov %vm1971_vm9 }
  0xcf   : > { %v612_v39 = vmax.f32 %v544_v12, 0.0  ;;  %v727_v40 = vsel %vm669_vm13, %v604_v57, 0.0  ;;  %v787_v41 = vadd.f32 %v786_v22, %v719_v17  ;;  %v448_v52 = vsub.f32 %v312_v23, %v380_v26  ;;  %v388_v56 = vld [vmem:[%s1443_s24 + $0x158] sm:$0xff] }
  0xd0   : > { %v509_v55 = vadd.f32 %v1458_v25, %v440_v18  ;;  %v569_v62 = vmax.f32 %v501_v19, 0.0  ;;  %v684_v31 = vsel %vm658_vm2, %v561_v20, 0.0  ;;  %v616_v63 = vmax.f32 %v548_v16, 0.0  ;;  %v324_v6 = vld [vmem:[%s1437_s25 + $0x178] sm:$0xff]  ;;  %vm1975_vm2 = vmmov %vm1972_vm8 }
  0xd1   : > { %v731_v32 = vsel %vm670_vm14, %v608_v21, 0.0  ;;  %v788_v0 = vadd.f32 %v787_v41, %v723_v24  ;;  %v793_v2 = vadd.f32 %v680_v28, %v676_v34  ;;  %v452_v1 = vsub.f32 %v316_v43, %v384_v44  ;;  %v392_v7 = vld [vmem:[%s1443_s24 + $0x178] sm:$0xff] }
  0xd2   : > { %v513_v50 = vadd.f32 %v1458_v25, %v444_v27  ;;  %v573_v3 = vmax.f32 %v505_v29, 0.0  ;;  %v688_v51 = vsel %vm659_vm3, %v565_v33, 0.0  ;;  %v735_v35 = vsel %vm671_vm15, %v612_v39, 0.0  ;;  %v328_v14 = vld [vmem:[%s1437_s25 + $0x198] sm:$0xff] }
  0xd3   : > { %v789_v4 = vadd.f32 %v788_v0, %v727_v40  ;;  %v794_v9 = vadd.f32 %v793_v2, %v684_v31  ;;  %v456_v8 = vsub.f32 %v320_v30, %v388_v56  ;;  %v517_v10 = vadd.f32 %v1458_v25, %v448_v52  ;;  %v396_v15 = vld [vmem:[%s1443_s24 + $0x198] sm:$0xff] }
  0xd4   : > { %v577_v11 = vmax.f32 %v509_v55, 0.0  ;;  %v692_v13 = vsel %vm660_vm4, %v569_v62, 0.0  ;;  %v739_v36 = vsel %vm672_vm10, %v616_v63, 0.0  ;;  %v460_v16 = vsub.f32 %v324_v6, %v392_v7  ;;  %v400_v19 = vld [vmem:[%s1443_s24 + $0x1b8] sm:$0xff] }
  0xd5   : > { %v790_v49 = vadd.f32 %v789_v4, %v731_v32  ;;  %v795_v12 = vadd.f32 %v794_v9, %v688_v51  ;;  %v521_v57 = vadd.f32 %v1458_v25, %v452_v1  ;;  %v581_v5 = vmax.f32 %v513_v50, 0.0  ;;  %v336_v27 = vld [vmem:[%s1437_s25 + $0x1d8] sm:$0xff] }
  0xd6   : > { %v696_v17 = vsel %vm661_vm5, %v573_v3, 0.0  ;;  %v464_v21 = vsub.f32 %v328_v14, %v396_v15  ;;  %v525_v24 = vadd.f32 %v1458_v25, %v456_v8  ;;  %v585_v22 = vmax.f32 %v517_v10, 0.0  ;;  %v340_v40 = vld [vmem:[%s1437_s25 + $0x1f8] sm:$0xff] }
  0xd7   : > { %v791_v18 = vadd.f32 %v790_v49, %v735_v35  ;;  %v796_v20 = vadd.f32 %v795_v12, %v692_v13  ;;  %v700_v23 = vsel %vm662_vm6, %v577_v11, 0.0  ;;  %v468_v33 = vsub.f32 %v332_v37, %v400_v19  ;;  %v408_v41 = vld [vmem:[%s1443_s24 + $0x1f8] sm:$0xff] }
  0xd8   : > { %v529_v34 = vadd.f32 %v1458_v25, %v460_v16  ;;  %v589_v28 = vmax.f32 %v521_v57, 0.0  ;;  %v704_v39 = vsel %vm663_vm7, %v581_v5, 0.0  ;;  %v472_v44 = vsub.f32 %v336_v27, %v404_v38  ;;  %v344_v62 = vld [vmem:[%s1437_s25 + $0x218] sm:$0xff]  ;;  %s1118_s25 = scalar_lea.vmem %s1117_s26, 1024 }
  0xd9   : > { %v792_v26 = vadd.f32 %v791_v18, %v739_v36  ;;  %v797_v29 = vadd.f32 %v796_v20, %v696_v17  ;;  %v533_v42 = vadd.f32 %v1458_v25, %v464_v21  ;;  %v593_v52 = vmax.f32 %v525_v24, 0.0  ;;  %v412_v31 = vld [vmem:[%s1443_s24 + $0x218] sm:$0xff]  ;;  %p1120_p13 = scmp.lt.s32.totalorder %s1118_s25, %s1112_s22 }
  0xda   : > { %vm1973_vm0 = vcmp.lt.s32.totalorder %v1482_v46, 257  ;;  %v476_v32 = vsub.f32 %v340_v40, %v408_v41  ;;  %v537_v0 = vadd.f32 %v1458_v25, %v468_v33  ;;  %v597_v30 = vmax.f32 %v529_v34, 0.0 }
  0xdb   : > { %v798_v43 = vadd.f32 %v797_v29, %v700_v23  ;;  %v708_v55 = vsel %vm1973_vm0, %v585_v22, 0.0  ;;  %815 = vst [vmem:[%s1716_s5 + $0x10] sm:$0xff] %v792_v26  ;;  %v712_v45 = vsel %vm1974_vm1, %v589_v28, 0.0  ;;  %v480_v2 = vsub.f32 %v344_v62, %v412_v31  ;;  %p1121_p1 = por %p1120_p13, %p1119_p12 }
  0xdc   : > { %v541_v1 = vadd.f32 %v1458_v25, %v472_v44  ;;  %v601_v50 = vmax.f32 %v533_v42, 0.0  ;;  %v716_v46 = vsel %vm1975_vm2, %v593_v52, 0.0  ;;  %v545_v51 = vadd.f32 %v1458_v25, %v476_v32 }
  0xdd   : > { %v799_v63 = vadd.f32 %v798_v43, %v704_v39  ;;  %v605_v35 = vmax.f32 %v537_v0, 0.0  ;;  %v720_v4 = vsel %vm667_vm11, %v597_v30, 0.0  ;;  %v549_v47 = vadd.f32 %v1458_v25, %v480_v2  ;;  %p1122_p2 = pnand %p1121_p1, %p1115_p11 }
  0xde   : > { %v609_v7 = vmax.f32 %v541_v1, 0.0  ;;  %v724_v9 = vsel %vm668_vm12, %v601_v50, 0.0  ;;  %v613_v48 = vmax.f32 %v545_v51, 0.0 }
  0xdf   : > { %v800_v56 = vadd.f32 %v799_v63, %v708_v55  ;;  %v728_v10 = vsel %vm669_vm13, %v605_v35, 0.0  ;;  %v617_v13 = vmax.f32 %v549_v47, 0.0 }
  0xe0   : > { %v732_v53 = vsel %vm670_vm14, %v609_v7, 0.0  ;;  %v736_v25 = vsel %vm671_vm15, %v613_v48, 0.0 }
  0xe1   : > { %v801_v3 = vadd.f32 %v800_v56, %v712_v45  ;;  %v740_v54 = vsel %vm672_vm10, %v617_v13, 0.0 }
  0xe3   : > { %v802_v6 = vadd.f32 %v801_v3, %v716_v46 }
  0xe5   : > { %v803_v8 = vadd.f32 %v802_v6, %v720_v4 }
  0xe7   : > { %v804_v11 = vadd.f32 %v803_v8, %v724_v9 }
  0xe9   : > { %v805_v36 = vadd.f32 %v804_v11, %v728_v10 }
  0xeb   : > { %v806_v49 = vadd.f32 %v805_v36, %v732_v53 }
  0xed   : > { %v807_v14 = vadd.f32 %v806_v49, %v736_v25 }
  0xef   : > { %v808_v58 = vadd.f32 %v807_v14, %v740_v54 }
  0xf1   : > { %816 = vst [vmem:[%s1716_s5 + $0x18] sm:$0xff] %v808_v58 }
  0xf2   : > { %1125 = shalt.err (!%p1122_p2)
}
  0xf3   : > { %s1126_s4 = scalar_lea.hbm %s1895_s12, 512  ;;  %s1130_s10 = scalar_lea.hbm %s1958_s3, 1024 }
  0xf4   : > { %p1127_p3 = scmp.ne.s32.totalorder %s1895_s12, %s1126_s4  ;;  %p1131_p5 = scmp.lt.u32.totalorder %s1895_s12, %s1958_s3 }
  0xf5   : > { %p1132_p4 = scmp.lt.u32.totalorder %s1130_s10, %s1126_s4  ;;  %p1134_p8 = scmp.lt.u32.totalorder %s1126_s4, %s1895_s12 }
  0xf6   : > { %p1128_p10 = pnand %p1127_p3, %p1976_p6 }
  0xf7   : > { %p1133_p7 = por %p1132_p4, %p1131_p5 }
  0xf8   : > { %p1129_p0 = pneg %p1128_p10 }
  0xf9   : > { %p1135_p9 = por %p1134_p8, %p1133_p7 }
  0xfb   : > { %p1136_p11 = pnand %p1135_p9, %p1129_p0 }
  0xfd   : > { %1139 = shalt.err (!%p1136_p11)
}
  0xfe   : > { %972 = dma.vmem_to_hbm [thread:$0]  (%p1976_p6), %s1897_s27, 512, %s1895_s12, %s818_s13  }
  0xff PF: > { %s844_s5 = sand.u32 1, %s1190_s14   ;;  %p1977_p12 = scmp.ne.s32.totalorder %s1969_s9, 0 }
 0x100   : > { %p1978_p13 = scmp.ge.s32.totalorder %s1222_s21, 2  ;;  %s845_s17 = scalar_lea.sflag [#allocation6], %s844_s5 }
 0x102   : > { %p975_p1 = pnand %p1978_p13, %p1977_p12 }
 0x104   : > { %1185 = dma.done.wait (!%p975_p1), %s845_s17, 512  }
 0x105   : > { %1187 = vsyncadd (!%p975_p1), %s845_s17, 4294966784  ;;  %s23_s21 = sadd.s32 1, %s1222_s21   ;;  %s1979_s8 = sld [smem:[#allocation13_spill]] }
 0x106   : > { %p20_p2 = scmp.ge.s32.totalorder %s23_s21, 4   ;;  %s1980_s14 = smov %s1194_s15 }
 0x107   : > { %s1981_s15 = smov %s1198_s16  ;;  %s1982_s16 = smov %s1326_s6 }
 0x108   : > { %s1983_s17 = smov %s1206_s18  ;;  %s1984_s18 = smov %s1210_s19 }
 0x109   : > { %s1985_s19 = smov %s1329_s7  ;;  %s1986_s20 = smov %s1218_s0 }
 0x10a   :  { %22 = sbr.rel (!%p20_p2) target bundleno = 12 (0xc), region = 90 }
 0x10b   : > { %s1987_s0 = smov %s1979_s8 }
 0x111   :  { %850 = vsyncpa [#allocation5], 1 }
 0x112   :  { %852 = vsyncpa [#allocation5 + $0x1], 1 }
 0x113   :  { %853 = vsyncpa [#allocation8], 1 }
 0x114   :  { %855 = vsyncpa [#allocation8 + $0x1], 1 }
 0x115   :  { %856 = vsyncpa [#allocation6], 1 }
 0x116   :  { %858 = vsyncpa [#allocation6 + $0x1], 1 }

</bundles_post_ra>
